<compile_context>
chip_gen: v5e
topology: v5e:2x2
jax: 0.10.0
libtpu: 0.0.40
codegen_flags: <defaults>
</compile_context>

<pallas_src>
import functools

import jax
import jax.numpy as jnp
from jax import lax
from jax.experimental import pallas as pl
from jax.experimental.pallas import tpu as pltpu


# --------------------------- Fused Pallas kernel -----------------------------

def _fused_attention_kernel(heads, head_dim, scale, kv_tile,
                            x_ref, w_qkv_ref, w_out_t_ref, b_out_ref,
                            o_ref, qkv_ref, y_acc_ref):
    """One batch element per grid step; all intermediates stay in VMEM."""
    f32, bf16 = jnp.float32, jnp.bfloat16
    inner = heads * head_dim
    n = x_ref.shape[2]
    n_kv = n // kv_tile

    # -- to_qkv (1x1 conv, no bias): channel matmul, bf16 operands, f32 acc. --
    x = x_ref[0].astype(bf16)                            # (DIM, N) channel-major
    w_qkv = w_qkv_ref[...].astype(bf16)                  # (3*inner, DIM)
    qkv = jnp.dot(w_qkv, x, preferred_element_type=f32)  # (3*inner, N) f32

    # Fold the softmax scale into q (in f32), then park all of qkv as bf16 in
    # VMEM: halves the resident buffer and the per-head reads feed the MXU
    # directly.  Channel-major, so every head slice below is a sublane slice.
    qkv_ref[0:inner, :] = (qkv[0:inner] * scale).astype(bf16)
    qkv_ref[inner:3 * inner, :] = qkv[inner:3 * inner].astype(bf16)

    # -- per-head attention with the output projection fused in. --------------
    y_acc_ref[...] = jnp.zeros_like(y_acc_ref)

    def head_body(h, carry):
        lo = pl.multiple_of(h * head_dim, head_dim)
        q = qkv_ref[pl.ds(lo, head_dim), :]              # (D, N) bf16, pre-scaled

        # Flash-style online softmax over KV chunks: only a (kv_tile, N) score
        # slab is live.  Keys on sublanes, queries on lanes -> the running
        # max/sum/rescale broadcasts need no transposes and the head output
        # comes out channel-major.
        def kv_body(c, state):
            m_i, l_i, acc = state
            j0 = pl.multiple_of(c * kv_tile, kv_tile)
            k_c = qkv_ref[pl.ds(inner + lo, head_dim), pl.ds(j0, kv_tile)]
            v_c = qkv_ref[pl.ds(2 * inner + lo, head_dim), pl.ds(j0, kv_tile)]

            # s[j, i] = sum_d k[d, j] * q[d, i]           -> (kv_tile, N) f32
            s = lax.dot_general(k_c, q, (((0,), (0,)), ((), ())),
                                preferred_element_type=f32)
            m_new = jnp.maximum(m_i, jnp.max(s, axis=0, keepdims=True))   # (1, N)
            alpha = jnp.exp(m_i - m_new)                                  # (1, N)
            p = jnp.exp(s - m_new)                                        # f32
            l_new = alpha * l_i + jnp.sum(p, axis=0, keepdims=True)
            pv = jnp.dot(v_c, p.astype(bf16), preferred_element_type=f32) # (D, N)
            return m_new, l_new, alpha * acc + pv

        m0 = jnp.full((1, n), -jnp.inf, dtype=f32)
        l0 = jnp.zeros((1, n), dtype=f32)
        acc0 = jnp.zeros((head_dim, n), dtype=f32)
        _, l_i, acc = lax.fori_loop(0, n_kv, kv_body, (m0, l0, acc0))

        # Softmax normalisation: EUP approximate reciprocal co-issues with the
        # surrounding MXU/VPU work.
        head_out = acc * pl.reciprocal(l_i, approx=True)          # (D, N) f32

        # Output projection folded into the head loop:
        #   y += w_out[:, lo:hi] @ head_out, expressed as a dim-0/dim-0
        # contraction on the (inner, DIM) weight so the head slice is a free
        # sublane slice.  Removes the (inner, N) concat buffer entirely.
        w_h = w_out_t_ref[pl.ds(lo, head_dim), :].astype(bf16)    # (D, DIM)
        y_acc_ref[...] += lax.dot_general(
            w_h, head_out.astype(bf16), (((0,), (0,)), ((), ())),
            preferred_element_type=f32)                           # (DIM, N)
        return carry

    lax.fori_loop(0, heads, head_body, 0, unroll=True)

    # -- to_out bias; dropout = identity (inference).  Lane-dense store. ------
    o_ref[0] = y_acc_ref[...] + b_out_ref[...]


# --------------------------- Forward pass ------------------------------------

def attention_forward(x, w_qkv, w_out, b_out, heads, head_dim, kv_tile=None):
    """Equivalent of Attention.forward with similarity='dot' (inference).

    x:      (B, DIM, N)     float32  (PyTorch NCL Conv1d layout)
    w_qkv:  (3*inner, DIM)  Conv1d(dim, inner*3, 1, bias=False) weight (k=1 squeezed)
    w_out:  (DIM, inner)    Conv1d(inner, dim, 1) weight (k=1 squeezed)
    b_out:  (DIM,)          Conv1d bias
    returns (B, DIM, N)
    """
    B, DIM, N = x.shape
    inner = heads * head_dim
    scale = float(head_dim) ** -0.5
    if kv_tile is None:
        kv_tile = 512 if (N > 512 and N % 512 == 0) else N
    assert N % kv_tile == 0, "position count must be divisible by kv_tile"

    # One-time relayout of the small output-projection weight to (inner, DIM)
    # so the per-head slices inside the kernel are sublane (row) slices.
    w_out_t = jnp.transpose(w_out)
    b_out_col = b_out.reshape(DIM, 1)

    # Explicit VMEM budget from the actual resident set (double-buffered I/O
    # blocks + weights + scratch + per-head temporaries), 2x margin, clamped
    # to stay inside v7x's 64 MiB physical VMEM.
    io_blocks = 2 * 2 * DIM * N * 4
    weights = 2 * (3 * inner * DIM + inner * DIM + DIM) * 4
    scratch = 3 * inner * N * 2 + DIM * N * 4
    temps = (3 * inner * N + 2 * kv_tile * N + (head_dim + 2) * N) * 4
    vmem_bytes = int(max(4 << 20,
                         min(2 * (io_blocks + weights + scratch + temps),
                             48 << 20)))

    kernel = functools.partial(_fused_attention_kernel,
                               heads, head_dim, scale, kv_tile)
    return pl.pallas_call(
        kernel,
        out_shape=jax.ShapeDtypeStruct((B, DIM, N), jnp.float32),
        grid=(B,),
        in_specs=[
            pl.BlockSpec((1, DIM, N), lambda b: (b, 0, 0)),      # x
            pl.BlockSpec((3 * inner, DIM), lambda b: (0, 0)),    # w_qkv
            pl.BlockSpec((inner, DIM), lambda b: (0, 0)),        # w_out^T
            pl.BlockSpec((DIM, 1), lambda b: (0, 0)),            # b_out
        ],
        out_specs=pl.BlockSpec((1, DIM, N), lambda b: (b, 0, 0)),
        scratch_shapes=[
            pltpu.VMEM((3 * inner, N), jnp.bfloat16),   # qkv, channel-major
            pltpu.VMEM((DIM, N), jnp.float32),          # output-projection acc
        ],
        compiler_params=pltpu.CompilerParams(
            dimension_semantics=("parallel",),           # batch across TCs
            vmem_limit_bytes=vmem_bytes),
    )(x, w_qkv, w_out_t, b_out_col)


# --------------------------- Pure-JAX reference -------------------------------

def attention_reference(x, w_qkv, w_out, b_out, heads, head_dim):
    B, DIM, N = x.shape
    inner = heads * head_dim
    scale = float(head_dim) ** -0.5
    qkv = jnp.einsum('bcn,oc->bno', x, w_qkv)                 # (B, N, 3*inner)
    q, k, v = jnp.split(qkv, 3, axis=-1)

    def to_bhnd(t):
        return jnp.transpose(t.reshape(B, N, heads, head_dim), (0, 2, 1, 3))

    q, k, v = map(to_bhnd, (q, k, v))
    smi = jnp.einsum('bhid,bhjd->bhij', q, k) * scale
    attn = jax.nn.softmax(smi, axis=-1)
    out = jnp.einsum('bhij,bhjd->bhid', attn, v)              # (B, H, N, D)
    out = jnp.transpose(out, (0, 1, 3, 2)).reshape(B, inner, N)  # 'b h n d -> b (h d) n'
    y = jnp.einsum('bcn,oc->bon', out, w_out) + b_out[None, :, None]
    return y


# --------------------------- Main ---------------------------------------------

if __name__ == "__main__":
    # Small shapes consistent with the module: x is (B, DIM, N).  N = 128 keeps
    # the output lane-dense (unmasked stores) while staying small.
    B, DIM, N = 2, 32, 128
    HEADS, HEAD_DIM = 2, 16
    INNER = HEADS * HEAD_DIM

    key = jax.random.PRNGKey(0)
    kx, kq, kw, kb = jax.random.split(key, 4)

    x = jax.random.normal(kx, (B, DIM, N), dtype=jnp.float32)
    w_qkv = 0.05 * jax.random.normal(kq, (3 * INNER, DIM), dtype=jnp.float32)
    w_out = 0.05 * jax.random.normal(kw, (DIM, INNER), dtype=jnp.float32)
    b_out = 0.05 * jax.random.normal(kb, (DIM,), dtype=jnp.float32)

    y = attention_forward(x, w_qkv, w_out, b_out, HEADS, HEAD_DIM)
    y = jax.block_until_ready(y)

    y_ref = attention_reference(x, w_qkv, w_out, b_out, HEADS, HEAD_DIM)
    assert y.shape == (B, DIM, N)
    # Tolerance covers bf16 operand rounding across the four chained matmuls
    # (f32 accumulation) plus the EUP approximate reciprocal; tightened vs the
    # previous revision's 1e-2.
    assert jnp.allclose(y, y_ref, atol=5e-3, rtol=5e-3), "mismatch vs JAX reference"

    print("KERNEL_OK")
</pallas_src>

<mosaic_0001>
module attributes {stable_mosaic.version = 11 : i64} {
  func.func @_fused_attention_kernel(%arg0: i32, %arg1: memref<1x32x128xf32, #tpu.memory_space<vmem>>, %arg2: memref<96x32xf32, #tpu.memory_space<vmem>>, %arg3: memref<32x32xf32, #tpu.memory_space<vmem>>, %arg4: memref<32x1xf32, #tpu.memory_space<vmem>>, %arg5: memref<1x32x128xf32, #tpu.memory_space<vmem>>, %arg6: memref<96x128xbf16, #tpu.memory_space<vmem>>, %arg7: memref<32x128xf32, #tpu.memory_space<vmem>>) attributes {dimension_semantics = [#tpu.dimension_semantics<parallel>], iteration_bounds = array<i64: 2>, scalar_prefetch = 0 : i64, scratch_operands = 2 : i64, tpu.core_type = #tpu.core_type<tc>, window_params = [{transform_indices = @transform_0, window_bounds = array<i64: 1, 32, 128>}, {pipeline_mode = #tpu.pipeline_mode<synchronous>, transform_indices = @transform_1, window_bounds = array<i64: 96, 32>}, {pipeline_mode = #tpu.pipeline_mode<synchronous>, transform_indices = @transform_2, window_bounds = array<i64: 32, 32>}, {pipeline_mode = #tpu.pipeline_mode<synchronous>, transform_indices = @transform_3, window_bounds = array<i64: 32, 1>}, {transform_indices = @transform_4, window_bounds = array<i64: 1, 32, 128>}]} {
    %c0 = arith.constant 0 : index
    %c0_0 = arith.constant 0 : index
    %c0_1 = arith.constant 0 : index
    %0 = vector.load %arg1[%c0, %c0_0, %c0_1] : memref<1x32x128xf32, #tpu.memory_space<vmem>>, vector<1x32x128xf32>
    %1 = vector.shape_cast %0 : vector<1x32x128xf32> to vector<32x128xf32>
    %2 = arith.truncf %1 : vector<32x128xf32> to vector<32x128xbf16>
    %c0_2 = arith.constant 0 : index
    %c0_3 = arith.constant 0 : index
    %3 = vector.load %arg2[%c0_2, %c0_3] : memref<96x32xf32, #tpu.memory_space<vmem>>, vector<96x32xf32>
    %4 = arith.truncf %3 : vector<96x32xf32> to vector<96x32xbf16>
    %cst = arith.constant dense<0.000000e+00> : vector<96x128xf32>
    %5 = tpu.matmul %4, %2, %cst {dimension_numbers = #tpu.dot_dimension_numbers<[1], [0], [0], [1], [0, 0, 1, 1], [], []>} : vector<96x32xbf16>, vector<32x128xbf16>, vector<96x128xf32> -> vector<96x128xf32>
    %6 = vector.extract_strided_slice %5 {offsets = [0, 0], sizes = [32, 128], strides = [1, 1]} : vector<96x128xf32> to vector<32x128xf32>
    %cst_4 = arith.constant 2.500000e-01 : f32
    %7 = vector.broadcast %cst_4 : f32 to vector<32x128xf32>
    %8 = arith.mulf %6, %7 : vector<32x128xf32>
    %9 = arith.truncf %8 : vector<32x128xf32> to vector<32x128xbf16>
    %c0_5 = arith.constant 0 : index
    %c0_6 = arith.constant 0 : index
    %10 = vector.load %arg6[%c0_5, %c0_6] : memref<96x128xbf16, #tpu.memory_space<vmem>>, vector<32x128xbf16>
    tpu.vector_store %arg6[%c0_5, %c0_6], %9 {strides = array<i32>} : memref<96x128xbf16, #tpu.memory_space<vmem>>, vector<32x128xbf16>,
    %11 = vector.extract_strided_slice %5 {offsets = [32, 0], sizes = [64, 128], strides = [1, 1]} : vector<96x128xf32> to vector<64x128xf32>
    %12 = arith.truncf %11 : vector<64x128xf32> to vector<64x128xbf16>
    %c32 = arith.constant 32 : index
    %c0_7 = arith.constant 0 : index
    %13 = vector.load %arg6[%c32, %c0_7] : memref<96x128xbf16, #tpu.memory_space<vmem>>, vector<64x128xbf16>
    tpu.vector_store %arg6[%c32, %c0_7], %12 {strides = array<i32>} : memref<96x128xbf16, #tpu.memory_space<vmem>>, vector<64x128xbf16>,
    %cst_8 = arith.constant 0.000000e+00 : f32
    %14 = vector.broadcast %cst_8 : f32 to vector<32x128xf32>
    %c0_9 = arith.constant 0 : index
    %c0_10 = arith.constant 0 : index
    %15 = vector.load %arg7[%c0_9, %c0_10] : memref<32x128xf32, #tpu.memory_space<vmem>>, vector<32x128xf32>
    tpu.vector_store %arg7[%c0_9, %c0_10], %14 {strides = array<i32>} : memref<32x128xf32, #tpu.memory_space<vmem>>, vector<32x128xf32>,
    %c0_i32 = arith.constant 0 : i32
    %c16_i32 = arith.constant 16 : i32
    %16 = arith.muli %c0_i32, %c16_i32 : i32
    %17 = tpu.assume_multiple %16, 16 : i32
    %18 = arith.index_cast %17 : i32 to index
    %c0_11 = arith.constant 0 : index
    %19 = vector.load %arg6[%18, %c0_11] : memref<96x128xbf16, #tpu.memory_space<vmem>>, vector<16x128xbf16>
    %cst_12 = arith.constant 0xFF800000 : f32
    %20 = vector.broadcast %cst_12 : f32 to vector<1x128xf32>
    %cst_13 = arith.constant 0.000000e+00 : f32
    %21 = vector.broadcast %cst_13 : f32 to vector<1x128xf32>
    %cst_14 = arith.constant 0.000000e+00 : f32
    %22 = vector.broadcast %cst_14 : f32 to vector<16x128xf32>
    %c0_i32_15 = arith.constant 0 : i32
    %c128_i32 = arith.constant 128 : i32
    %23 = arith.muli %c0_i32_15, %c128_i32 : i32
    %24 = tpu.assume_multiple %23, 128 : i32
    %c32_i32 = arith.constant 32 : i32
    %25 = arith.addi %c32_i32, %17 : i32
    %26 = arith.index_cast %25 : i32 to index
    %27 = arith.index_cast %24 : i32 to index
    %28 = vector.load %arg6[%26, %27] : memref<96x128xbf16, #tpu.memory_space<vmem>>, vector<16x128xbf16>
    %c64_i32 = arith.constant 64 : i32
    %29 = arith.addi %c64_i32, %17 : i32
    %30 = arith.index_cast %29 : i32 to index
    %31 = arith.index_cast %24 : i32 to index
    %32 = vector.load %arg6[%30, %31] : memref<96x128xbf16, #tpu.memory_space<vmem>>, vector<16x128xbf16>
    %cst_16 = arith.constant dense<0.000000e+00> : vector<128x128xf32>
    %33 = tpu.matmul %28, %19, %cst_16 {dimension_numbers = #tpu.dot_dimension_numbers<[0], [0], [1], [1], [0, 1, 1, 1], [], []>} : vector<16x128xbf16>, vector<16x128xbf16>, vector<128x128xf32> -> vector<128x128xf32>
    %cst_17 = arith.constant dense<0xFF800000> : vector<128xf32>
    %34 = vector.multi_reduction <maximumf>, %33, %cst_17 [0] : vector<128x128xf32> to vector<128xf32>
    %35 = vector.shape_cast %34 : vector<128xf32> to vector<1x128xf32>
    %36 = arith.maximumf %20, %35 : vector<1x128xf32>
    %37 = arith.subf %20, %36 : vector<1x128xf32>
    %38 = math.exp %37 : vector<1x128xf32>
    %39 = vector.broadcast %36 : vector<1x128xf32> to vector<128x128xf32>
    %40 = arith.subf %33, %39 : vector<128x128xf32>
    %41 = math.exp %40 : vector<128x128xf32>
    %42 = arith.mulf %38, %21 : vector<1x128xf32>
    %cst_18 = arith.constant dense<0.000000e+00> : vector<128xf32>
    %43 = vector.multi_reduction <add>, %41, %cst_18 [0] : vector<128x128xf32> to vector<128xf32>
    %44 = vector.shape_cast %43 : vector<128xf32> to vector<1x128xf32>
    %45 = arith.addf %42, %44 : vector<1x128xf32>
    %46 = arith.truncf %41 : vector<128x128xf32> to vector<128x128xbf16>
    %cst_19 = arith.constant dense<0.000000e+00> : vector<16x128xf32>
    %47 = tpu.matmul %32, %46, %cst_19 {dimension_numbers = #tpu.dot_dimension_numbers<[1], [0], [0], [1], [0, 0, 1, 1], [], []>} : vector<16x128xbf16>, vector<128x128xbf16>, vector<16x128xf32> -> vector<16x128xf32>
    %48 = vector.broadcast %38 : vector<1x128xf32> to vector<16x128xf32>
    %49 = arith.mulf %48, %22 : vector<16x128xf32>
    %50 = arith.addf %49, %47 : vector<16x128xf32>
    %c1_i32 = arith.constant 1 : i32
    %51 = tpu.reciprocal %45 {approx = true} : vector<1x128xf32> -> vector<1x128xf32>
    %52 = vector.broadcast %51 : vector<1x128xf32> to vector<16x128xf32>
    %53 = arith.mulf %50, %52 : vector<16x128xf32>
    %54 = arith.index_cast %17 : i32 to index
    %c0_20 = arith.constant 0 : index
    %55 = vector.load %arg3[%54, %c0_20] : memref<32x32xf32, #tpu.memory_space<vmem>>, vector<16x32xf32>
    %56 = arith.truncf %55 : vector<16x32xf32> to vector<16x32xbf16>
    %c0_21 = arith.constant 0 : index
    %c0_22 = arith.constant 0 : index
    %57 = vector.load %arg7[%c0_21, %c0_22] : memref<32x128xf32, #tpu.memory_space<vmem>>, vector<32x128xf32>
    %58 = arith.truncf %53 : vector<16x128xf32> to vector<16x128xbf16>
    %cst_23 = arith.constant dense<0.000000e+00> : vector<32x128xf32>
    %59 = tpu.matmul %56, %58, %cst_23 {dimension_numbers = #tpu.dot_dimension_numbers<[0], [0], [1], [1], [0, 1, 1, 1], [], []>} : vector<16x32xbf16>, vector<16x128xbf16>, vector<32x128xf32> -> vector<32x128xf32>
    %60 = arith.addf %57, %59 : vector<32x128xf32>
    %c0_24 = arith.constant 0 : index
    %c0_25 = arith.constant 0 : index
    %61 = vector.load %arg7[%c0_24, %c0_25] : memref<32x128xf32, #tpu.memory_space<vmem>>, vector<32x128xf32>
    tpu.vector_store %arg7[%c0_24, %c0_25], %60 {strides = array<i32>} : memref<32x128xf32, #tpu.memory_space<vmem>>, vector<32x128xf32>,
    %c1_i32_26 = arith.constant 1 : i32
    %c16_i32_27 = arith.constant 16 : i32
    %62 = arith.muli %c1_i32_26, %c16_i32_27 : i32
    %63 = tpu.assume_multiple %62, 16 : i32
    %64 = arith.index_cast %63 : i32 to index
    %c0_28 = arith.constant 0 : index
    %65 = vector.load %arg6[%64, %c0_28] : memref<96x128xbf16, #tpu.memory_space<vmem>>, vector<16x128xbf16>
    %cst_29 = arith.constant 0xFF800000 : f32
    %66 = vector.broadcast %cst_29 : f32 to vector<1x128xf32>
    %cst_30 = arith.constant 0.000000e+00 : f32
    %67 = vector.broadcast %cst_30 : f32 to vector<1x128xf32>
    %cst_31 = arith.constant 0.000000e+00 : f32
    %68 = vector.broadcast %cst_31 : f32 to vector<16x128xf32>
    %c0_i32_32 = arith.constant 0 : i32
    %c128_i32_33 = arith.constant 128 : i32
    %69 = arith.muli %c0_i32_32, %c128_i32_33 : i32
    %70 = tpu.assume_multiple %69, 128 : i32
    %c32_i32_34 = arith.constant 32 : i32
    %71 = arith.addi %c32_i32_34, %63 : i32
    %72 = arith.index_cast %71 : i32 to index
    %73 = arith.index_cast %70 : i32 to index
    %74 = vector.load %arg6[%72, %73] : memref<96x128xbf16, #tpu.memory_space<vmem>>, vector<16x128xbf16>
    %c64_i32_35 = arith.constant 64 : i32
    %75 = arith.addi %c64_i32_35, %63 : i32
    %76 = arith.index_cast %75 : i32 to index
    %77 = arith.index_cast %70 : i32 to index
    %78 = vector.load %arg6[%76, %77] : memref<96x128xbf16, #tpu.memory_space<vmem>>, vector<16x128xbf16>
    %cst_36 = arith.constant dense<0.000000e+00> : vector<128x128xf32>
    %79 = tpu.matmul %74, %65, %cst_36 {dimension_numbers = #tpu.dot_dimension_numbers<[0], [0], [1], [1], [0, 1, 1, 1], [], []>} : vector<16x128xbf16>, vector<16x128xbf16>, vector<128x128xf32> -> vector<128x128xf32>
    %cst_37 = arith.constant dense<0xFF800000> : vector<128xf32>
    %80 = vector.multi_reduction <maximumf>, %79, %cst_37 [0] : vector<128x128xf32> to vector<128xf32>
    %81 = vector.shape_cast %80 : vector<128xf32> to vector<1x128xf32>
    %82 = arith.maximumf %66, %81 : vector<1x128xf32>
    %83 = arith.subf %66, %82 : vector<1x128xf32>
    %84 = math.exp %83 : vector<1x128xf32>
    %85 = vector.broadcast %82 : vector<1x128xf32> to vector<128x128xf32>
    %86 = arith.subf %79, %85 : vector<128x128xf32>
    %87 = math.exp %86 : vector<128x128xf32>
    %88 = arith.mulf %84, %67 : vector<1x128xf32>
    %cst_38 = arith.constant dense<0.000000e+00> : vector<128xf32>
    %89 = vector.multi_reduction <add>, %87, %cst_38 [0] : vector<128x128xf32> to vector<128xf32>
    %90 = vector.shape_cast %89 : vector<128xf32> to vector<1x128xf32>
    %91 = arith.addf %88, %90 : vector<1x128xf32>
    %92 = arith.truncf %87 : vector<128x128xf32> to vector<128x128xbf16>
    %cst_39 = arith.constant dense<0.000000e+00> : vector<16x128xf32>
    %93 = tpu.matmul %78, %92, %cst_39 {dimension_numbers = #tpu.dot_dimension_numbers<[1], [0], [0], [1], [0, 0, 1, 1], [], []>} : vector<16x128xbf16>, vector<128x128xbf16>, vector<16x128xf32> -> vector<16x128xf32>
    %94 = vector.broadcast %84 : vector<1x128xf32> to vector<16x128xf32>
    %95 = arith.mulf %94, %68 : vector<16x128xf32>
    %96 = arith.addf %95, %93 : vector<16x128xf32>
    %c1_i32_40 = arith.constant 1 : i32
    %97 = tpu.reciprocal %91 {approx = true} : vector<1x128xf32> -> vector<1x128xf32>
    %98 = vector.broadcast %97 : vector<1x128xf32> to vector<16x128xf32>
    %99 = arith.mulf %96, %98 : vector<16x128xf32>
    %100 = arith.index_cast %63 : i32 to index
    %c0_41 = arith.constant 0 : index
    %101 = vector.load %arg3[%100, %c0_41] : memref<32x32xf32, #tpu.memory_space<vmem>>, vector<16x32xf32>
    %102 = arith.truncf %101 : vector<16x32xf32> to vector<16x32xbf16>
    %c0_42 = arith.constant 0 : index
    %c0_43 = arith.constant 0 : index
    %103 = vector.load %arg7[%c0_42, %c0_43] : memref<32x128xf32, #tpu.memory_space<vmem>>, vector<32x128xf32>
    %104 = arith.truncf %99 : vector<16x128xf32> to vector<16x128xbf16>
    %cst_44 = arith.constant dense<0.000000e+00> : vector<32x128xf32>
    %105 = tpu.matmul %102, %104, %cst_44 {dimension_numbers = #tpu.dot_dimension_numbers<[0], [0], [1], [1], [0, 1, 1, 1], [], []>} : vector<16x32xbf16>, vector<16x128xbf16>, vector<32x128xf32> -> vector<32x128xf32>
    %106 = arith.addf %103, %105 : vector<32x128xf32>
    %c0_45 = arith.constant 0 : index
    %c0_46 = arith.constant 0 : index
    %107 = vector.load %arg7[%c0_45, %c0_46] : memref<32x128xf32, #tpu.memory_space<vmem>>, vector<32x128xf32>
    tpu.vector_store %arg7[%c0_45, %c0_46], %106 {strides = array<i32>} : memref<32x128xf32, #tpu.memory_space<vmem>>, vector<32x128xf32>,
    %c2_i32 = arith.constant 2 : i32
    %c0_47 = arith.constant 0 : index
    %c0_48 = arith.constant 0 : index
    %108 = vector.load %arg7[%c0_47, %c0_48] : memref<32x128xf32, #tpu.memory_space<vmem>>, vector<32x128xf32>
    %c0_49 = arith.constant 0 : index
    %c0_50 = arith.constant 0 : index
    %109 = vector.load %arg4[%c0_49, %c0_50] : memref<32x1xf32, #tpu.memory_space<vmem>>, vector<32x1xf32>
    %110 = vector.broadcast %109 : vector<32x1xf32> to vector<32x128xf32>
    %111 = arith.addf %108, %110 : vector<32x128xf32>
    %c0_51 = arith.constant 0 : index
    %c0_52 = arith.constant 0 : index
    %c0_53 = arith.constant 0 : index
    %112 = vector.load %arg5[%c0_51, %c0_52, %c0_53] : memref<1x32x128xf32, #tpu.memory_space<vmem>>, vector<1x32x128xf32>
    %113 = vector.shape_cast %112 : vector<1x32x128xf32> to vector<32x128xf32>
    %114 = vector.shape_cast %111 : vector<32x128xf32> to vector<1x32x128xf32>
    tpu.vector_store %arg5[%c0_51, %c0_52, %c0_53], %114 {strides = array<i32>} : memref<1x32x128xf32, #tpu.memory_space<vmem>>, vector<1x32x128xf32>,
    return
  }
  func.func @transform_0(%arg0: i32) -> (i32, i32, i32) {
    %c0_i32 = arith.constant 0 : i32
    %c0_i32_0 = arith.constant 0 : i32
    %c0_i32_1 = arith.constant 0 : i32
    return %arg0, %c0_i32, %c0_i32_0 : i32, i32, i32
  }
  func.func @transform_1(%arg0: i32) -> (i32, i32) {
    %c0_i32 = arith.constant 0 : i32
    %c0_i32_0 = arith.constant 0 : i32
    %c0_i32_1 = arith.constant 0 : i32
    return %c0_i32, %c0_i32_0 : i32, i32
  }
  func.func @transform_2(%arg0: i32) -> (i32, i32) {
    %c0_i32 = arith.constant 0 : i32
    %c0_i32_0 = arith.constant 0 : i32
    %c0_i32_1 = arith.constant 0 : i32
    return %c0_i32, %c0_i32_0 : i32, i32
  }
  func.func @transform_3(%arg0: i32) -> (i32, i32) {
    %c0_i32 = arith.constant 0 : i32
    %c0_i32_0 = arith.constant 0 : i32
    %c0_i32_1 = arith.constant 0 : i32
    return %c0_i32, %c0_i32_0 : i32, i32
  }
  func.func @transform_4(%arg0: i32) -> (i32, i32, i32) {
    %c0_i32 = arith.constant 0 : i32
    %c0_i32_0 = arith.constant 0 : i32
    %c0_i32_1 = arith.constant 0 : i32
    return %arg0, %c0_i32, %c0_i32_0 : i32, i32, i32
  }
}

</mosaic_0001>

<bundles_post_ra>
// kernel: tpu_custom_call.1
= control target key start
LH: loop header
LB: loop body
LE: loop exit
PB: predicated region body
PF: predicated region fallthrough
CT: control target
= control target key end

     0   :  { %9 = vsyncpa [#allocation5], 0  ;;  %s1736_s0 = inlined_call_operand.vmem [shape: f32[2,32,128], index: 0, kind: input, shape index: {}]   ;;  %s1737_s1 = inlined_call_operand.vmem [shape: f32[96,32], index: 1, kind: input, shape index: {}]   ;;  %s1738_s2 = inlined_call_operand.vmem [shape: f32[32,32], index: 2, kind: input, shape index: {}]   ;;  %s1739_s3 = inlined_call_operand.vmem [shape: f32[32,1], index: 3, kind: input, shape index: {}]   ;;  %s1740_s4 = inlined_call_operand.hbm [shape: f32[2,32,128], index: 4, kind: output, shape index: {}]  }
   0x1   :  { %11 = vsyncpa [#allocation5 + $0x1], 0  ;;  %s1359_s15 = smov 0   ;;  %s1361_s16 = smov 0  }
   0x2   :  { %s1363_s17 = smov 0   ;;  %s1365_s18 = smov 0  }
   0x3 LB: > { %s1380_s19 = sadd.s32 4294967295, %s1329_s18   ;;  %s1044_s20 = sadd.s32 4294967294, %s1329_s18   ;;  %s1329_s18 = sphi %s1365_s18, %s1746_s18   ;;  %s1325_s17 = sphi %s1363_s17, %s1745_s17   ;;  %s1321_s16 = sphi %s1361_s16, %s1744_s16   ;;  %s1317_s15 = sphi %s1359_s15, %s1743_s15  }
   0x4   : > { %s1384_s21 = sadd.s32 1, %s1329_s18   ;;  %s113_s22 = sadd.s32 1, %s1325_s17 }
   0x5   : > { %s110_s23 = ssub.s32 %s1329_s18, %s1384_s21  ;;  %p123_p0 = scmp.ne.s32.totalorder %s1325_s17, %s1321_s16 }
   0x6   : > { %p111_p1 = scmp.eq.s32.totalorder %s110_s23, 0  ;;  %p124_p2 = scmp.eq.s32.totalorder %s1380_s19, 1 }
   0x7   : > { %p129_p3 = scmp.ne.s32.totalorder %s1321_s16, %s1317_s15  ;;  %p130_p4 = scmp.eq.s32.totalorder %s1044_s20, 1 }
   0x8   : > { %s1395_s24 = scalar_select %p111_p1, %s1325_s17, %s113_s22  }
   0x9   : > { %p1397_p5 = por %p124_p2, %p123_p0  ;;  %p1401_p6 = por %p130_p4, %p129_p3 }
   0xa   : > { %p1047_p7 = scmp.ge.s32.totalorder %s1329_s18, 1  ;;  %p165_p8 = scmp.lt.s32.totalorder %s1329_s18, 3 }
   0xc   : > { %p166_p9 = pnand %p1047_p7, %p165_p8 }
   0xd   : > { %p191_p10 = scmp.lt.s32.totalorder (!%p166_p9), %s1380_s19, 1  ;;  %s188_s12 = sand.u32 (!%p166_p9), 1, %s1321_s16  }
   0xe   : > { %169 = sbr.rel (%p166_p9) target bundleno = 1194 (0x4aa), region = 36  ;;  %s1048_s13 = sshll.u32 (!%p166_p9), %s188_s12, 5 }
   0xf   : > { %s190_s14 = scalar_lea.vmem (!%p166_p9), [#allocation4], %s1048_s13  ;;  %s1115_s20 = sshll.u32 (!%p166_p9), %s1380_s19, 5 }
  0x10   : > { %s959_s30 = scalar_lea.sflag (!%p166_p9), [#allocation5], %s188_s12  ;;  %s1287_s8 = scalar_lea.hbm (!%p166_p9), %s1740_s4, 64 }
  0x13   : > { %s192_s27 = scalar_select %p191_p10, %s1380_s19, 1  ;;  %v203_v6 = vld [vmem:[%s1737_s1] sm:$0xff]  ;;  %v204_v7 = vld [vmem:[%s1737_s1 + $0x8] sm:$0xff]  ;;  %vm221_vm0 = vcmask 261120   ;;  %v205_v9 = vld [vmem:[%s1737_s1 + $0x10] sm:$0xff]  ;;  %vm357_vm1 = vcmask 130048  }
  0x14   : > { %v215_v8 = vpack.c.bf16 %v204_v7, %v203_v6  ;;  %v206_v10 = vld [vmem:[%s1737_s1 + $0x18] sm:$0xff]  ;;  %v207_v12 = vld [vmem:[%s1737_s1 + $0x20] sm:$0xff]  ;;  %v208_v13 = vld [vmem:[%s1737_s1 + $0x28] sm:$0xff] }
  0x15   : > { %s1108_s28 = sshll.u32 %s192_s27, 5  ;;  %v216_v11 = vpack.c.bf16 %v206_v10, %v205_v9  ;;  %v217_v14 = vpack.c.bf16 %v208_v13, %v207_v12  ;;  %v209_v16 = vld [vmem:[%s1737_s1 + $0x30] sm:$0xff]  ;;  %v210_v17 = vld [vmem:[%s1737_s1 + $0x38] sm:$0xff]  ;;  %v211_v46 = vld [vmem:[%s1737_s1 + $0x40] sm:$0xff]  ;;  %s970_s27 = scalar_lea.hbm %s1740_s4, %s1115_s20 }
  0x16   : > { %s195_s5 = scalar_lea.vmem %s1736_s0, %s1108_s28  ;;  %v218_v18 = vpack.c.bf16 %v210_v17, %v209_v16  ;;  %v212_v47 = vld [vmem:[%s1737_s1 + $0x48] sm:$0xff]  ;;  %s971_s28 = sshll.u32 %s190_s14, 4  ;;  %s972_s28 = int_to_ptr.vmem [resolvable:$true] %s971_s28 }
  0x17   : > { %v199_v0 = vld [vmem:[%s195_s5 + $0x10] sm:$0xff]  ;;  %v200_v1 = vld [vmem:[%s195_s5 + $0x18] sm:$0xff]  ;;  %v197_v2 = vld [vmem:[%s195_s5] sm:$0xff]  ;;  %v219_v48 = vpack.c.bf16 %v212_v47, %v211_v46  ;;  %s973_s29 = sshll.u32 %s970_s27, 4  ;;  %s974_s29 = int_to_ptr.hbm [resolvable:$true] %s973_s29 }
  0x18   : > { %v202_v3 = vpack.c.bf16 %v200_v1, %v199_v0  ;;  %v198_v4 = vld [vmem:[%s195_s5 + $0x8] sm:$0xff]  ;;  %s1281_s5 = sshra.s32 %s974_s29, 4  ;;  %s1282_s5 = int_to_ptr.hbm [resolvable:$true] %s1281_s5 }
  0x19   : > { %v201_v5 = vpack.c.bf16 %v198_v4, %v197_v2  ;;  %s1283_s19 = scalar_lea.hbm %s1282_s5, 32  ;;  %p1288_p0 = scmp.lt.s32.totalorder %s1282_s5, %s1740_s4 }
  0x1a   : > { %246 = vmatpush.bf16.msra.mxu0 %v202_v3  ;;  %p1284_p11 = scmp.ne.s32.totalorder %s1282_s5, %s1283_s19  ;;  %p1289_p1 = scmp.lt.s32.totalorder %s1287_s8, %s1283_s19 }
  0x1c   : > { %p1285_p12 = pnand %p1284_p11, %p1397_p5  ;;  %p1290_p2 = por %p1289_p1, %p1288_p0 }
  0x1e   : > { %247 = vmatpush.bf16.msra.mxu0 %v201_v5  ;;  %p1286_p13 = pneg %p1285_p12 }
  0x20   : > { %p1291_p3 = pnand %p1290_p2, %p1286_p13 }
  0x21   : > { %1051 = vmatmul.msk.bf16.vlgmr.msra.gmra.mxu0 %vm221_vm0, %v215_v8 }
  0x31   : > { %1052 = vmatmul.msk.bf16.gmra.mxu0 %vm221_vm0, %v216_v11 }
  0x41   : > { %1053 = vmatmul.msk.bf16.gmra.mxu0 %vm221_vm0, %v217_v14 }
  0x51   : > { %1054 = vmatmul.msk.bf16.gmra.mxu0 %vm221_vm0, %v218_v18 }
  0x61   : > { %1055 = vmatmul.msk.bf16.gmra.mxu0 %vm221_vm0, %v219_v48 }
  0x9e   : > { %v249_v15 = vpop.f32.mrf.mxu0 }
  0x9f   : > { %v279_v20 = vmul.f32 0.25, %v249_v15 }
  0xa6   : > { %v251_v19 = vpop.f32.mrf.mxu0 }
  0xa7   : > { %v280_v21 = vmul.f32 0.25, %v251_v19 }
  0xa9   : > { %v1119_v22 = vpack.c.bf16 %v280_v21, %v279_v20 }
  0xab   : > { %1120 = vst [vmem:[#allocation2 + $0x28] sm:$0xff] %v1119_v22  }
  0xae   : > { %v254_v23 = vpop.f32.mrf.mxu0 }
  0xaf   : > { %v281_v26 = vmul.f32 0.25, %v254_v23 }
  0xb2   : > { %v1109_v24 = vld [vmem:[#allocation2 + $0x28] sm:$0xff] }
  0xb3   : > { %389 = vmatpush.bf16.msra.mxu1 %v1109_v24 }
  0xb6   : > { %v256_v25 = vpop.f32.mrf.mxu0 }
  0xb7   : > { %v282_v27 = vmul.f32 0.25, %v256_v25 }
  0xb9   : > { %v1124_v28 = vpack.c.bf16 %v282_v27, %v281_v26 }
  0xbb   : > { %1146 = vst [vmem:[#allocation2 + $0x10] sm:$0xff] %v1124_v28  }
  0xbe   : > { %v259_v29 = vpop.f32.mrf.mxu0 }
  0xc2   : > { %v1112_v30 = vld [vmem:[#allocation2 + $0x10] sm:$0xff] }
  0xc3   : > { %694 = vmatpush.bf16.msra.mxu3 %v1112_v30 }
  0xc6   : > { %v261_v31 = vpop.f32.mrf.mxu0 }
  0xc7   : > { %v1129_v32 = vpack.c.bf16 %v261_v31, %v259_v29 }
  0xc9   : > { %1147 = vst [vmem:[#allocation2 + $0x8] sm:$0xff] %v1129_v32  }
  0xce   : > { %v264_v34 = vpop.f32.mrf.mxu0 }
  0xd0   : > { %v1110_v33 = vld [vmem:[#allocation2 + $0x8] sm:$0xff] }
  0xd1   : > { %335 = vxpose.xlu0.c.b16.start.end [1/1] (short) %v1110_v33, 128 }
  0xd6   : > { %v266_v35 = vpop.f32.mrf.mxu0 }
  0xd7   : > { %v1134_v36 = vpack.c.bf16 %v266_v35, %v264_v34  ;;  %v559_v35 = vld [vmem:[%s1738_s2] sm:$0xff] }
  0xd9   : > { %1148 = vst [vmem:[#allocation2] sm:$0xff] %v1134_v36   ;;  %v560_v36 = vld [vmem:[%s1738_s2 + $0x8] sm:$0xff] }
  0xde   : > { %v269_v33 = vpop.f32.mrf.mxu0 }
  0xe0   : > { %v1113_v37 = vld [vmem:[#allocation2] sm:$0xff] }
  0xe6   : > { %v271_v47 = vpop.f32.mrf.mxu0 }
 0x151   : > { %641 = vxpose.xlu0.c.b16.start.end [1/1] (short) %v1113_v37, 128 }
 0x17d   : > { %v343_v38 = vpop.trf.xlu0 }
 0x17e   : > { %1065 = vmatmul.msk.bf16.vlgmr.msra.gmra.mxu1 %vm357_vm1, %v343_v38 }
 0x18d   : > { %v344_v39 = vpop.trf.xlu0 }
 0x18e   : > { %1066 = vmatmul.msk.bf16.gmra.mxu1 %vm357_vm1, %v344_v39 }
 0x19d   : > { %v345_v40 = vpop.trf.xlu0 }
 0x19e   : > { %1067 = vmatmul.msk.bf16.gmra.mxu1 %vm357_vm1, %v345_v40 }
 0x1ad   : > { %v346_v41 = vpop.trf.xlu0 }
 0x1ae   : > { %1068 = vmatmul.msk.bf16.gmra.mxu1 %vm357_vm1, %v346_v41 }
 0x1bd   : > { %v347_v42 = vpop.trf.xlu0 }
 0x1be   : > { %1069 = vmatmul.msk.bf16.gmra.mxu1 %vm357_vm1, %v347_v42 }
 0x1cd   : > { %v348_v43 = vpop.trf.xlu0 }
 0x1ce   : > { %1070 = vmatmul.msk.bf16.gmra.mxu1 %vm357_vm1, %v348_v43  ;;  %v561_v43 = vpack.c.bf16 %v560_v36, %v559_v35 }
 0x1d0   : > { %567 = vxpose.xlu1.c.b16.start.end [1/1] (short) (narrow) %v561_v43, 32 }
 0x1dd   : > { %v349_v44 = vpop.trf.xlu0 }
 0x1de   : > { %1071 = vmatmul.msk.bf16.gmra.mxu1 %vm357_vm1, %v349_v44 }
 0x1ed   : > { %v350_v45 = vpop.trf.xlu0 }
 0x1ee   : > { %1072 = vmatmul.msk.bf16.gmra.mxu1 %vm357_vm1, %v350_v45 }
 0x1fb   : > { %v391_v49 = vpop.f32.mrf.mxu1 }
 0x1fd   : > { %v649_v50 = vpop.trf.xlu0 }
 0x1fe   : > { %1087 = vmatmul.msk.bf16.vlgmr.msra.gmra.mxu3 %vm357_vm1, %v649_v50  ;;  %v1139_v50 = vpack.c.bf16 %v271_v47, %v269_v33 }
 0x200   : > { %1149 = vst [vmem:[#allocation2 + $0x18] sm:$0xff] %v1139_v50  }
 0x203   : > { %v393_v51 = vpop.f32.mrf.mxu1 }
 0x20b   : > { %v396_v52 = vpop.f32.mrf.mxu1 }
 0x20d   : > { %v650_v53 = vpop.trf.xlu0 }
 0x20e   : > { %1088 = vmatmul.msk.bf16.gmra.mxu3 %vm357_vm1, %v650_v53 }
 0x213   : > { %v1457_v54 = vpop.f32.mrf.mxu1 }
 0x21b   : > { %v1459_v55 = vpop.f32.mrf.mxu1 }
 0x21c   : > { %v431_v9 = vmax.f32 %v391_v49, %v1459_v55 }
 0x21d   : > { %v651_v56 = vpop.trf.xlu0 }
 0x21e   : > { %1089 = vmatmul.msk.bf16.gmra.mxu3 %vm357_vm1, %v651_v56 }
 0x223   : > { %v1462_v57 = vpop.f32.mrf.mxu1 }
 0x224   : > { %v432_v8 = vmax.f32 %v393_v51, %v1462_v57 }
 0x22b   : > { %v1464_v58 = vpop.f32.mrf.mxu1 }
 0x22c   : > { %v433_v10 = vmax.f32 %v396_v52, %v1464_v58 }
 0x22d   : > { %v652_v59 = vpop.trf.xlu0 }
 0x22e   : > { %1090 = vmatmul.msk.bf16.gmra.mxu3 %vm357_vm1, %v652_v59 }
 0x233   : > { %v1467_v60 = vpop.f32.mrf.mxu1 }
 0x234   : > { %v434_v11 = vmax.f32 %v1457_v54, %v1467_v60 }
 0x23b   : > { %v1469_v61 = vpop.f32.mrf.mxu1 }
 0x23c   : > { %v435_v13 = vmax.f32 %v431_v9, %v1469_v61 }
 0x23d   : > { %v653_v62 = vpop.trf.xlu0 }
 0x23e   : > { %1091 = vmatmul.msk.bf16.gmra.mxu3 %vm357_vm1, %v653_v62 }
 0x243   : > { %v1472_v63 = vpop.f32.mrf.mxu1 }
 0x244   : > { %v436_v12 = vmax.f32 %v432_v8, %v1472_v63 }
 0x24b   : > { %v1474_v0 = vpop.f32.mrf.mxu1 }
 0x24c   : > { %v437_v14 = vmax.f32 %v433_v10, %v1474_v0 }
 0x24d   : > { %v654_v1 = vpop.trf.xlu0 }
 0x24e   : > { %1092 = vmatmul.msk.bf16.gmra.mxu3 %vm357_vm1, %v654_v1 }
 0x253   : > { %v1477_v2 = vpop.f32.mrf.mxu1 }
 0x254   : > { %v438_v15 = vmax.f32 %v434_v11, %v1477_v2 }
 0x25b   : > { %v1479_v3 = vpop.f32.mrf.mxu1 }
 0x25c   : > { %v439_v18 = vmax.f32 %v435_v13, %v1479_v3 }
 0x25d   : > { %v655_v4 = vpop.trf.xlu0 }
 0x25e   : > { %1093 = vmatmul.msk.bf16.gmra.mxu3 %vm357_vm1, %v655_v4 }
 0x263   : > { %v1482_v5 = vpop.f32.mrf.mxu1 }
 0x264   : > { %v440_v16 = vmax.f32 %v436_v12, %v1482_v5 }
 0x266   : > { %v443_v21 = vmax.f32 %v439_v18, %v440_v16 }
 0x26b   : > { %v1484_v6 = vpop.f32.mrf.mxu1 }
 0x26c   : > { %v441_v19 = vmax.f32 %v437_v14, %v1484_v6 }
 0x26d   : > { %v656_v7 = vpop.trf.xlu0 }
 0x26e   : > { %1094 = vmatmul.msk.bf16.gmra.mxu3 %vm357_vm1, %v656_v7 }
 0x273   : > { %v428_v17 = vpop.f32.mrf.mxu1 }
 0x274   : > { %v442_v20 = vmax.f32 %v438_v15, %v428_v17 }
 0x276   : > { %v444_v22 = vmax.f32 %v441_v19, %v442_v20 }
 0x278   : > { %v445_v23 = vmax.f32 %v443_v21, %v444_v22 }
 0x27a   : > { %v446_v24 = vrot.slane %v445_v23, 4 }
 0x27c   : > { %v447_v25 = vmax.f32 %v445_v23, %v446_v24 }
 0x27e   : > { %v448_v26 = vrot.slane %v447_v25, 2 }
 0x280   : > { %v449_v27 = vmax.f32 %v447_v25, %v448_v26 }
 0x281   : > { %v1499_v28 = vpop.f32.mrf.mxu3 }
 0x282   : > { %v450_v29 = vrot.slane %v449_v27, 1 }
 0x284   : > { %v1501_v30 = vmax.f32 %v449_v27, %v450_v29 }
 0x286   : > { %v455_v31 = vsub.f32 %v391_v49, %v1501_v30  ;;  %v456_v32 = vsub.f32 %v393_v51, %v1501_v30  ;;  %v457_v34 = vsub.f32 %v396_v52, %v1501_v30  ;;  %v458_v38 = vsub.f32 %v1457_v54, %v1501_v30 }
 0x287   : > { %v459_v41 = vsub.f32 %v1459_v55, %v1501_v30  ;;  %v460_v44 = vsub.f32 %v1462_v57, %v1501_v30  ;;  %v470_v46 = vsub.f32 %v428_v17, %v1501_v30  ;;  %v461_v48 = vsub.f32 %v1464_v58, %v1501_v30 }
 0x288   : > { %v471_v39 = vmul.f32 1.442695, %v455_v31  ;;  %v473_v40 = vmul.f32 1.442695, %v456_v32  ;;  %v475_v42 = vmul.f32 1.442695, %v457_v34  ;;  %v462_v51 = vsub.f32 %v1467_v60, %v1501_v30 }
 0x289   : > { %v1512_v37 = vpop.f32.mrf.mxu3  ;;  %v477_v45 = vmul.f32 1.442695, %v458_v38  ;;  %v479_v49 = vmul.f32 1.442695, %v459_v41  ;;  %v463_v53 = vsub.f32 %v1469_v61, %v1501_v30  ;;  %v481_v54 = vmul.f32 1.442695, %v460_v44 }
 0x28a   : > { %1195 = vpow2.f32 %v471_v39  ;;  %v501_v56 = vmul.f32 1.442695, %v470_v46  ;;  %v469_v57 = vsub.f32 %v1484_v6, %v1501_v30  ;;  %v467_v59 = vsub.f32 %v1479_v3, %v1501_v30  ;;  %v213_v44 = vld [vmem:[%s1737_s1 + $0x50] sm:$0xff] }
 0x28b   : > { %1197 = vpow2.f32 %v473_v40  ;;  %v483_v60 = vmul.f32 1.442695, %v461_v48  ;;  %v468_v62 = vsub.f32 %v1482_v5, %v1501_v30  ;;  %v485_v61 = vmul.f32 1.442695, %v462_v51 }
 0x28c   : > { %1199 = vpow2.f32 %v475_v42  ;;  %v464_v7 = vsub.f32 %v1472_v63, %v1501_v30  ;;  %v487_v6 = vmul.f32 1.442695, %v463_v53  ;;  %v499_v8 = vmul.f32 1.442695, %v469_v57 }
 0x28d   : > { %1201 = vpow2.f32 %v477_v45  ;;  %v465_v5 = vsub.f32 %v1474_v0, %v1501_v30  ;;  %v495_v10 = vmul.f32 1.442695, %v467_v59  ;;  %v466_v11 = vsub.f32 %v1477_v2, %v1501_v30  ;;  %v214_v45 = vld [vmem:[%s1737_s1 + $0x58] sm:$0xff] }
 0x28e   : > { %1203 = vpow2.f32 %v479_v49  ;;  %v497_v12 = vmul.f32 1.442695, %v468_v62  ;;  %v489_v14 = vmul.f32 1.442695, %v464_v7  ;;  %v220_v46 = vpack.c.bf16 %v214_v45, %v213_v44 }
 0x28f   : > { %1205 = vpow2.f32 %v481_v54  ;;  %v491_v18 = vmul.f32 1.442695, %v465_v5  ;;  %v493_v19 = vmul.f32 1.442695, %v466_v11  ;;  %v452_v47 = vsub.f32 -inf, %v1501_v30  ;;  %v1111_v11 = vld [vmem:[#allocation2 + $0x18] sm:$0xff] }
 0x290   : > { %v1529_v55 = vpop.eup %1195  ;;  %1207 = vpow2.f32 %v501_v56  ;;  %1056 = vmatmul.msk.bf16.gmra.mxu0 %vm221_vm0, %v220_v46 }
 0x291   : > { %v1525_v52 = vpop.f32.mrf.mxu3  ;;  %v1533_v58 = vpop.eup %1197  ;;  %1209 = vpow2.f32 %v483_v60  ;;  %v453_v51 = vmul.f32 1.442695, %v452_v47 }
 0x292   : > { %v504_v1 = vadd.f32 %v1533_v58, %v1529_v55  ;;  %v1541_v4 = vpop.eup %1199  ;;  %1211 = vpow2.f32 %v485_v61  ;;  %v526_v5 = vpack.c.bf16 %v1533_v58, %v1529_v55 }
 0x293   : > { %v1546_v9 = vpop.eup %1201  ;;  %1213 = vpow2.f32 %v487_v6 }
 0x294   : > { %v505_v3 = vadd.f32 %v1541_v4, %v504_v1  ;;  %v1204_v13 = vpop.eup %1203  ;;  %1215 = vpow2.f32 %v499_v8  ;;  %v527_v1 = vpack.c.bf16 %v1546_v9, %v1541_v4 }
 0x295   : > { %v1206_v17 = vpop.eup %1205  ;;  %1217 = vpow2.f32 %v495_v10 }
 0x296   : > { %v506_v63 = vadd.f32 %v1546_v9, %v505_v3  ;;  %v1208_v0 = vpop.eup %1207  ;;  %1219 = vpow2.f32 %v497_v12  ;;  %v528_v60 = vpack.c.bf16 %v1206_v17, %v1204_v13 }
 0x297   : > { %v1210_v21 = vpop.eup %1209  ;;  %1221 = vpow2.f32 %v489_v14 }
 0x298   : > { %v507_v16 = vadd.f32 %v1204_v13, %v506_v63  ;;  %v1212_v2 = vpop.eup %1211  ;;  %1223 = vpow2.f32 %v491_v18 }
 0x299   : > { %v1553_v15 = vpop.f32.mrf.mxu3  ;;  %v1214_v23 = vpop.eup %1213  ;;  %1225 = vpow2.f32 %v493_v19  ;;  %v529_v54 = vpack.c.bf16 %v1212_v2, %v1210_v21 }
 0x29a   : > { %v508_v20 = vadd.f32 %v1206_v17, %v507_v16  ;;  %v1216_v24 = vpop.eup %1215  ;;  %1227 = vpow2.f32 %v453_v51 }
 0x29b   : > { %v1218_v26 = vpop.eup %1217  ;;  %v533_v27 = vpack.c.bf16 %v1208_v0, %v1216_v24 }
 0x29c   : > { %v509_v22 = vadd.f32 %v1210_v21, %v508_v20  ;;  %v1220_v31 = vpop.eup %1219 }
 0x29d   : > { %v1222_v33 = vpop.eup %1221  ;;  %540 = vmatpush.bf16.msra.mxu2 %v533_v27  ;;  %v532_v36 = vpack.c.bf16 %v1220_v31, %v1218_v26 }
 0x29e   : > { %v510_v25 = vadd.f32 %v1212_v2, %v509_v22  ;;  %v1224_v35 = vpop.eup %1223  ;;  %v530_v49 = vpack.c.bf16 %v1222_v33, %v1214_v23 }
 0x29f   : > { %v1226_v38 = vpop.eup %1225 }
 0x2a0   : > { %v511_v32 = vadd.f32 %v1214_v23, %v510_v25  ;;  %v531_v41 = vpack.c.bf16 %v1226_v38, %v1224_v35  ;;  %v1228_v30 = vpop.eup %1227 }
 0x2a1   : > { %v1555_v29 = vpop.f32.mrf.mxu3  ;;  %541 = vmatpush.bf16.msra.mxu2 %v532_v36  ;;  %v1573_v8 = vmul.f32 0.0, %v1228_v30 }
 0x2a2   : > { %v512_v34 = vadd.f32 %v1222_v33, %v511_v32  ;;  %v736_v58 = vmax.f32 %v1499_v28, %v1555_v29 }
 0x2a4   : > { %v513_v39 = vadd.f32 %v1224_v35, %v512_v34 }
 0x2a5   : > { %542 = vmatpush.bf16.msra.mxu2 %v531_v41 }
 0x2a6   : > { %v514_v40 = vadd.f32 %v1226_v38, %v513_v39 }
 0x2a8   : > { %v515_v43 = vadd.f32 %v1218_v26, %v514_v40 }
 0x2a9   : > { %v1557_v42 = vpop.f32.mrf.mxu3  ;;  %543 = vmatpush.bf16.msra.mxu2 %v530_v49 }
 0x2aa   : > { %v516_v48 = vadd.f32 %v1220_v31, %v515_v43  ;;  %v737_v55 = vmax.f32 %v1512_v37, %v1557_v42 }
 0x2ac   : > { %v517_v50 = vadd.f32 %v1216_v24, %v516_v48 }
 0x2ad   : > { %544 = vmatpush.bf16.msra.mxu2 %v529_v54 }
 0x2ae   : > { %v518_v53 = vadd.f32 %v1208_v0, %v517_v50 }
 0x2b0   : > { %v519_v57 = vrot.slane %v518_v53, 4 }
 0x2b1   : > { %v1567_v56 = vpop.f32.mrf.mxu3  ;;  %545 = vmatpush.bf16.msra.mxu2 %v528_v60 }
 0x2b2   : > { %v520_v59 = vadd.f32 %v519_v57, %v518_v53  ;;  %v738_v17 = vmax.f32 %v1525_v52, %v1567_v56 }
 0x2b4   : > { %v521_v62 = vrot.slane %v520_v59, 2 }
 0x2b5   : > { %546 = vmatpush.bf16.msra.mxu2 %v527_v1 }
 0x2b6   : > { %v522_v61 = vadd.f32 %v521_v62, %v520_v59 }
 0x2b8   : > { %v523_v6 = vrot.slane %v522_v61, 1 }
 0x2b9   : > { %v1571_v7 = vpop.f32.mrf.mxu3  ;;  %547 = vmatpush.bf16.msra.mxu2 %v526_v5 }
 0x2ba   : > { %v524_v3 = vadd.f32 %v523_v6, %v522_v61  ;;  %v739_v18 = vmax.f32 %v1553_v15, %v1571_v7 }
 0x2bc   : > { %v1578_v10 = vadd.f32 %v524_v3, %v1573_v8  ;;  %548 = vmatmul.bf16.vlgmr.msra.gmra.mxu2 %v1111_v11 }
 0x2c1   : > { %v716_v12 = vpop.f32.mrf.mxu3 }
 0x2c2   : > { %v740_v19 = vmax.f32 %v736_v58, %v716_v12 }
 0x2c9   : > { %v1580_v63 = vpop.f32.mrf.mxu3 }
 0x2ca   : > { %v741_v0 = vmax.f32 %v737_v55, %v1580_v63 }
 0x2d1   : > { %v1582_v4 = vpop.f32.mrf.mxu3 }
 0x2d2   : > { %v742_v20 = vmax.f32 %v738_v17, %v1582_v4 }
 0x2d9   : > { %v1584_v9 = vpop.f32.mrf.mxu3 }
 0x2da   : > { %v743_v21 = vmax.f32 %v739_v18, %v1584_v9 }
 0x2e1   : > { %v1586_v13 = vpop.f32.mrf.mxu3 }
 0x2e2   : > { %v744_v23 = vmax.f32 %v740_v19, %v1586_v13 }
 0x2e9   : > { %v1588_v14 = vpop.f32.mrf.mxu3 }
 0x2ea   : > { %v745_v2 = vmax.f32 %v741_v0, %v1588_v14 }
 0x2ec   : > { %v748_v26 = vmax.f32 %v744_v23, %v745_v2 }
 0x2f1   : > { %v1590_v16 = vpop.f32.mrf.mxu3 }
 0x2f2   : > { %v746_v24 = vmax.f32 %v742_v20, %v1590_v16 }
 0x2f9   : > { %v1604_v22 = vpop.f32.mrf.mxu3 }
 0x2fa   : > { %v747_v25 = vmax.f32 %v743_v21, %v1604_v22 }
 0x2fc   : > { %v749_v27 = vmax.f32 %v746_v24, %v747_v25 }
 0x2fe   : > { %v750_v31 = vmax.f32 %v748_v26, %v749_v27 }
 0x300   : > { %v751_v32 = vrot.slane %v750_v31, 4 }
 0x302   : > { %v752_v33 = vmax.f32 %v750_v31, %v751_v32 }
 0x304   : > { %v753_v34 = vrot.slane %v752_v33, 2 }
 0x306   : > { %v754_v35 = vmax.f32 %v752_v33, %v753_v34 }
 0x308   : > { %v755_v36 = vrot.slane %v754_v35, 1 }
 0x30a   : > { %v1609_v38 = vmax.f32 %v754_v35, %v755_v36 }
 0x30c   : > { %v760_v39 = vsub.f32 %v1499_v28, %v1609_v38  ;;  %v761_v40 = vsub.f32 %v1512_v37, %v1609_v38  ;;  %v762_v41 = vsub.f32 %v1525_v52, %v1609_v38  ;;  %v763_v43 = vsub.f32 %v1553_v15, %v1609_v38 }
 0x30d   : > { %v764_v46 = vsub.f32 %v1555_v29, %v1609_v38  ;;  %v765_v48 = vsub.f32 %v1557_v42, %v1609_v38  ;;  %v766_v37 = vsub.f32 %v1567_v56, %v1609_v38  ;;  %v767_v15 = vsub.f32 %v1571_v7, %v1609_v38 }
 0x30e   : > { %v776_v44 = vmul.f32 1.442695, %v760_v39  ;;  %v778_v45 = vmul.f32 1.442695, %v761_v40  ;;  %v780_v47 = vmul.f32 1.442695, %v762_v41  ;;  %v768_v51 = vsub.f32 %v716_v12, %v1609_v38 }
 0x30f   : > { %v782_v28 = vmul.f32 1.442695, %v763_v43  ;;  %v784_v52 = vmul.f32 1.442695, %v764_v46  ;;  %v786_v49 = vmul.f32 1.442695, %v765_v48  ;;  %v769_v56 = vsub.f32 %v1580_v63, %v1609_v38 }
 0x310   : > { %1229 = vpow2.f32 %v776_v44  ;;  %v788_v42 = vmul.f32 1.442695, %v766_v37  ;;  %v790_v57 = vmul.f32 1.442695, %v767_v15  ;;  %v770_v62 = vsub.f32 %v1582_v4, %v1609_v38  ;;  %v1099_v48 = vld [vmem:[%s1738_s2 + $0x10] sm:$0xff] }
 0x311   : > { %1231 = vpow2.f32 %v778_v45  ;;  %v792_v61 = vmul.f32 1.442695, %v768_v51  ;;  %v771_v7 = vsub.f32 %v1584_v9, %v1609_v38  ;;  %v794_v6 = vmul.f32 1.442695, %v769_v56  ;;  %v274_v45 = vpop.f32.mrf.mxu0 }
 0x312   : > { %1233 = vpow2.f32 %v780_v47  ;;  %v772_v11 = vsub.f32 %v1586_v13, %v1609_v38  ;;  %v796_v12 = vmul.f32 1.442695, %v770_v62  ;;  %v773_v55 = vsub.f32 %v1588_v14, %v1609_v38 }
 0x313   : > { %1235 = vpow2.f32 %v782_v28  ;;  %v798_v9 = vmul.f32 1.442695, %v771_v7  ;;  %v774_v18 = vsub.f32 %v1590_v16, %v1609_v38  ;;  %v775_v20 = vsub.f32 %v1604_v22, %v1609_v38  ;;  %v1100_v28 = vld [vmem:[%s1738_s2 + $0x18] sm:$0xff] }
 0x314   : > { %1237 = vpow2.f32 %v784_v52  ;;  %v800_v13 = vmul.f32 1.442695, %v772_v11  ;;  %v802_v14 = vmul.f32 1.442695, %v773_v55  ;;  %v757_v22 = vsub.f32 -inf, %v1609_v38 }
 0x315   : > { %1239 = vpow2.f32 %v786_v49  ;;  %v804_v23 = vmul.f32 1.442695, %v774_v18  ;;  %v806_v16 = vmul.f32 1.442695, %v775_v20  ;;  %v867_v37 = vpack.c.bf16 %v1100_v28, %v1099_v48 }
 0x316   : > { %v1627_v50 = vpop.eup %1229  ;;  %1241 = vpow2.f32 %v788_v42  ;;  %v758_v41 = vmul.f32 1.442695, %v757_v22 }
 0x317   : > { %v1629_v29 = vpop.eup %1231  ;;  %1243 = vpow2.f32 %v790_v57  ;;  %873 = vxpose.xlu1.c.b16.start.end [1/1] (short) (narrow) %v867_v37, 32 }
 0x318   : > { %v809_v53 = vadd.f32 %v1629_v29, %v1627_v50  ;;  %v1634_v54 = vpop.eup %1233  ;;  %1245 = vpow2.f32 %v792_v61 }
 0x319   : > { %v1639_v60 = vpop.eup %1235  ;;  %1247 = vpow2.f32 %v794_v6  ;;  %v276_v49 = vpop.f32.mrf.mxu0 }
 0x31a   : > { %v810_v59 = vadd.f32 %v1634_v54, %v809_v53  ;;  %v1644_v1 = vpop.eup %1237  ;;  %1249 = vpow2.f32 %v796_v12  ;;  %v1144_v51 = vpack.c.bf16 %v276_v49, %v274_v45  ;;  %v575_v12 = vpop.trf.xlu1  ;;  %v832_v18 = vpack.c.bf16 %v1639_v60, %v1634_v54 }
 0x31b   : > { %v1649_v5 = vpop.eup %1239  ;;  %1251 = vpow2.f32 %v798_v9 }
 0x31c   : > { %v811_v30 = vadd.f32 %v1639_v60, %v810_v59  ;;  %v1654_v4 = vpop.eup %1241  ;;  %1253 = vpow2.f32 %v800_v13  ;;  %1150 = vst [vmem:[#allocation2 + $0x20] sm:$0xff] %v1144_v51   ;;  %v831_v13 = vpack.c.bf16 %v1629_v29, %v1627_v50  ;;  %v1331_v60 = vmov 0  }
 0x31d   : > { %v1659_v17 = vpop.eup %1243  ;;  %1255 = vpow2.f32 %v802_v14  ;;  %1193 = vset.pattern.permute.xlu2 %v1331_v60  ;;  %1194 = vset.pattern.permute.xlu0 %v1331_v60 }
 0x31e   : > { %v812_v3 = vadd.f32 %v1644_v1, %v811_v30  ;;  %v1664_v19 = vpop.eup %1245  ;;  %1257 = vpow2.f32 %v804_v23  ;;  %v834_v9 = vpack.c.bf16 %v1659_v17, %v1654_v4 }
 0x31f   : > { %v1248_v2 = vpop.eup %1247  ;;  %1259 = vpow2.f32 %v806_v16  ;;  %v928_v16 = vld [vmem:[%s1739_s3 + $0x10] sm:$0xff] }
 0x320   : > { %v813_v63 = vadd.f32 %v1649_v5, %v812_v3  ;;  %v1250_v25 = vpop.eup %1249  ;;  %1261 = vpow2.f32 %v758_v41  ;;  %v835_v55 = vpack.c.bf16 %v1248_v2, %v1664_v19 }
 0x321   : > { %v1252_v27 = vpop.eup %1251  ;;  %1263 = vrcp.f32 %v1578_v10 }
 0x322   : > { %v814_v58 = vadd.f32 %v1654_v4, %v813_v63  ;;  %v1254_v32 = vpop.eup %1253  ;;  %v836_v63 = vpack.c.bf16 %v1252_v27, %v1250_v25 }
 0x323   : > { %v1256_v34 = vpop.eup %1255 }
 0x324   : > { %v815_v0 = vadd.f32 %v1659_v17, %v814_v58  ;;  %v1258_v36 = vpop.eup %1257  ;;  %v837_v10 = vpack.c.bf16 %v1256_v34, %v1254_v32  ;;  %v576_v58 = vpop.trf.xlu1 }
 0x325   : > { %v1260_v40 = vpop.eup %1259 }
 0x326   : > { %v816_v21 = vadd.f32 %v1664_v19, %v815_v0  ;;  %v1262_v52 = vpop.eup %1261  ;;  %v838_v11 = vpack.c.bf16 %v1260_v40, %v1258_v36  ;;  %v1114_v0 = vld [vmem:[#allocation2 + $0x20] sm:$0xff] }
 0x327   : > { %v808_v42 = vmul.f32 0.0, %v1262_v52  ;;  %v1264_v62 = vpop.eup %1263 }
 0x328   : > { %v817_v24 = vadd.f32 %v1248_v2, %v816_v21 }
 0x32a   : > { %v818_v26 = vadd.f32 %v1250_v25, %v817_v24 }
 0x32c   : > { %v819_v31 = vadd.f32 %v1252_v27, %v818_v26  ;;  %v929_v26 = vld [vmem:[%s1739_s3 + $0x18] sm:$0xff] }
 0x32e   : > { %v820_v33 = vadd.f32 %v1254_v32, %v819_v31 }
 0x330   : > { %v821_v35 = vadd.f32 %v1256_v34, %v820_v33 }
 0x332   : > { %v822_v39 = vadd.f32 %v1258_v36, %v821_v35 }
 0x334   : > { %v823_v43 = vadd.f32 %v1260_v40, %v822_v39 }
 0x336   : > { %v824_v44 = vrot.slane %v823_v43, 4 }
 0x338   : > { %v825_v46 = vadd.f32 %v824_v44, %v823_v43 }
 0x33a   : > { %v826_v47 = vrot.slane %v825_v46, 2 }
 0x33c   : > { %v827_v38 = vadd.f32 %v826_v47, %v825_v46 }
 0x33e   : > { %v828_v15 = vrot.slane %v827_v38, 1 }
 0x33f   : > { %v549_v57 = vpop.f32.mrf.mxu2 }
 0x340   : > { %v829_v53 = vadd.f32 %v828_v15, %v827_v38  ;;  %v554_v59 = vadd.f32 %v549_v57, %v1573_v8 }
 0x342   : > { %v830_v56 = vadd.f32 %v829_v53, %v808_v42  ;;  %v557_v61 = vmul.f32 %v1264_v62, %v554_v59 }
 0x344   : > { %1265 = vrcp.f32 %v830_v56 }
 0x347   : > { %v551_v30 = vpop.f32.mrf.mxu2 }
 0x348   : > { %v555_v7 = vadd.f32 %v551_v30, %v1573_v8  ;;  %v833_v8 = vpack.c.bf16 %v1649_v5, %v1644_v1  ;;  %v926_v1 = vld [vmem:[%s1739_s3] sm:$0xff]  ;;  %v927_v5 = vld [vmem:[%s1739_s3 + $0x8] sm:$0xff] }
 0x349   : > { %932 = vperm.xlu2 %1193, %v926_v1  }
 0x34a   : > { %v558_v6 = vmul.f32 %v1264_v62, %v555_v7  ;;  %v1266_v2 = vpop.eup %1265 }
 0x34c   : > { %v566_v3 = vpack.c.bf16 %v558_v6, %v557_v61 }
 0x34e   : > { %596 = vmatpush.bf16.msrb.mxu2 %v566_v3 }
 0x351   : > { %1077 = vmatmul.msk.bf16.vlgmr.msrb.gmra.mxu2 %vm357_vm1, %v575_v12  ;;  %937 = vperm.xlu2 %1193, %v927_v5  }
 0x352   : > { %845 = vmatpush.bf16.msra.mxu2 %v838_v11 }
 0x356   : > { %846 = vmatpush.bf16.msra.mxu2 %v837_v10 }
 0x359   : > { %942 = vperm.xlu2 %1193, %v928_v16  }
 0x35a   : > { %847 = vmatpush.bf16.msra.mxu2 %v836_v63 }
 0x35e   : > { %848 = vmatpush.bf16.msra.mxu2 %v835_v55 }
 0x361   : > { %1078 = vmatmul.msk.bf16.gmra.mxu2 %vm357_vm1, %v576_v58  ;;  %947 = vperm.xlu2 %1193, %v929_v26  }
 0x362   : > { %849 = vmatpush.bf16.msra.mxu2 %v834_v9 }
 0x366   : > { %850 = vmatpush.bf16.msra.mxu2 %v833_v8 }
 0x36a   : > { %851 = vmatpush.bf16.msra.mxu2 %v832_v18 }
 0x36e   : > { %852 = vmatpush.bf16.msra.mxu2 %v831_v13 }
 0x371   : > { %853 = vmatmul.bf16.vlgmr.msra.gmra.mxu2 %v1114_v0 }
 0x3a3   : > { %v933_v31 = vpop.permute.xlu2 %932 }
 0x3ab   : > { %v938_v22 = vpop.permute.xlu2 %937 }
 0x3b3   : > { %v943_v40 = vpop.permute.xlu2 %942 }
 0x3bb   : > { %v948_v47 = vpop.permute.xlu2 %947 }
 0x3c3   : > { %v881_v25 = vpop.trf.xlu1 }
 0x3d3   : > { %v882_v27 = vpop.trf.xlu1 }
 0x3d4   : > { %v598_v19 = vpop.f32.mrf.mxu2 }
 0x3dc   : > { %v600_v4 = vpop.f32.mrf.mxu2 }
 0x3e4   : > { %v603_v17 = vpop.f32.mrf.mxu2 }
 0x3ec   : > { %v605_v20 = vpop.f32.mrf.mxu2 }
 0x3f4   : > { %v854_v14 = vpop.f32.mrf.mxu2 }
 0x3f5   : > { %v859_v21 = vadd.f32 %v854_v14, %v808_v42 }
 0x3f7   : > { %v862_v54 = vmul.f32 %v1266_v2, %v859_v21 }
 0x3fc   : > { %v856_v50 = vpop.f32.mrf.mxu2 }
 0x3fd   : > { %v860_v29 = vadd.f32 %v856_v50, %v808_v42 }
 0x3ff   : > { %v863_v23 = vmul.f32 %v1266_v2, %v860_v29 }
 0x401   : > { %v872_v24 = vpack.c.bf16 %v863_v23, %v862_v54 }
 0x403   : > { %902 = vmatpush.bf16.msrb.mxu2 %v872_v24 }
 0x406   : > { %1101 = vmatmul.msk.bf16.vlgmr.msrb.gmra.mxu2 %vm357_vm1, %v881_v25 }
 0x416   : > { %1102 = vmatmul.msk.bf16.gmra.mxu2 %vm357_vm1, %v882_v27 }
 0x489   : > { %v904_v32 = vpop.f32.mrf.mxu2 }
 0x48a   : > { %v914_v33 = vadd.f32 %v904_v32, %v598_v19 }
 0x48c   : > { %v950_v34 = vadd.f32 %v933_v31, %v914_v33 }
 0x48e   : > { %954 = vst [vmem:[%s190_s14] sm:$0xff] %v950_v34 }
 0x491   : > { %v906_v35 = vpop.f32.mrf.mxu2 }
 0x492   : > { %v915_v36 = vadd.f32 %v906_v35, %v600_v4 }
 0x494   : > { %v951_v39 = vadd.f32 %v938_v22, %v915_v36 }
 0x496   : > { %955 = vst [vmem:[%s190_s14 + $0x8] sm:$0xff] %v951_v39 }
 0x499   : > { %v909_v41 = vpop.f32.mrf.mxu2 }
 0x49a   : > { %v916_v43 = vadd.f32 %v909_v41, %v603_v17 }
 0x49c   : > { %v952_v44 = vadd.f32 %v943_v40, %v916_v43 }
 0x49e   : > { %956 = vst [vmem:[%s190_s14 + $0x10] sm:$0xff] %v952_v44 }
 0x4a1   : > { %v911_v45 = vpop.f32.mrf.mxu2 }
 0x4a2   : > { %v917_v46 = vadd.f32 %v911_v45, %v605_v20 }
 0x4a4   : > { %v953_v48 = vadd.f32 %v948_v47, %v917_v46 }
 0x4a6   : > { %957 = vst [vmem:[%s190_s14 + $0x18] sm:$0xff] %v953_v48 }
 0x4a7   : > { %1294 = shalt.err (!%p1291_p3)
}
 0x4a8   : > { %s1332_s11 = smov 128   ;;  %s1333_s12 = smov 8  }
 0x4a9   : > { %1151 = dma.vmem_to_hbm [thread:$0]  (%p1397_p5), %s972_s28, 512, %s974_s29, %s959_s30, %s1332_s11, %s1332_s11, %s1333_s12  }
 0x4aa PF: > { %p1157_p4 = scmp.ge.s32.totalorder %s1329_s18, 2  ;;  %s988_s13 = sand.u32 1, %s1317_s15  }
 0x4ab   : > { %s989_s14 = scalar_lea.sflag [#allocation5], %s988_s13 }
 0x4ac   : > { %p1154_p7 = pnand %p1157_p4, %p1401_p6 }
 0x4ae   : > { %p1155_p8 = pneg %p1154_p7 }
 0x4b0   : > { %1312 = dma.done.wait (%p1155_p8), %s989_s14, 512  }
 0x4b1   : > { %1314 = vsyncadd (%p1155_p8), %s989_s14, 4294966784  ;;  %p14_p9 = scmp.ge.s32.totalorder %s1384_s21, 4   ;;  %s1743_s15 = smov %s1321_s16 }
 0x4b2   : > { %s1744_s16 = smov %s1325_s17  ;;  %s1745_s17 = smov %s1395_s24 }
 0x4b3   : > { %s1746_s18 = smov %s1384_s21  ;;  %16 = sbr.rel (!%p14_p9) target bundleno = 3 (0x3), region = 77 }
 0x4b8   :  { %995 = vsyncpa [#allocation5], 1 }
 0x4b9   :  { %997 = vsyncpa [#allocation5 + $0x1], 1 }

</bundles_post_ra>
